<compile_context>
chip_gen: v5e
topology: v5e:2x2
jax: 0.10.0
libtpu: 0.0.40
codegen_flags: <defaults>
</compile_context>

<pallas_src>
import jax
import jax.numpy as jnp
from jax import lax
from jax.experimental import pallas as pl
from jax.experimental.pallas import tpu as pltpu

# --- config mirroring GraphClassifier.__init__ params -----------------------
B = 16           # batch of graphs
N = 8            # max nodes per graph (padded/fixed)
L = 2            # params.num_gcn_layers
D = 16           # params.emb_dim
F = L * D        # flattened per-node 'repr' dim
R = 16           # params.rel_emb_dim
NUM_RELS = 4     # params.num_rels
FC_IN = 3 * F + R  # add_ht_emb=True, add_pt_emb=False

TB = 8           # batch tile (grid over B)


def graph_classifier_kernel(repr_ref, ids_ref, nn_ref, rel_ref,
                            w3_ref, wr_ref, b_ref, out_ref):
    repr_ = repr_ref[...]                                    # [TB, N, F] f32
    ids = ids_ref[...]                                       # [TB, N]    i32
    n_nodes = nn_ref[...]                                    # [TB, 1]    i32
    rel = rel_ref[...]                                       # [TB, R]    f32 (pre-gathered)

    # Validity of padded node slots + per-node coefficients.
    iota_n = lax.broadcasted_iota(jnp.int32, (repr_.shape[0], N), 1)
    valid = iota_n < n_nodes                                 # [TB, N] bool
    inv_n = 1.0 / n_nodes.astype(jnp.float32)                # [TB, 1]
    c_g = jnp.where(valid, inv_n, 0.0)                       # mean coefficient
    c_h = jnp.where(valid & (ids == 1), 1.0, 0.0)            # head selector
    c_t = jnp.where(valid & (ids == 2), 1.0, 0.0)            # tail selector

    # Per-node dots with the three FC weight segments (VPU mul + lane reduce;
    # the MXU is deliberately not used — output width is 1).
    w_g = w3_ref[0:1, :]                                     # [1, F]
    w_h = w3_ref[1:2, :]
    w_t = w3_ref[2:3, :]
    pg = jnp.sum(repr_ * w_g[None, :, :], axis=-1)           # [TB, N]
    ph = jnp.sum(repr_ * w_h[None, :, :], axis=-1)           # [TB, N]
    pt = jnp.sum(repr_ * w_t[None, :, :], axis=-1)           # [TB, N]

    node_score = c_g * pg + c_h * ph + c_t * pt              # [TB, N]
    graph_score = jnp.sum(node_score, axis=-1, keepdims=True)  # [TB, 1]

    # Relation-embedding contribution of the FC.
    rel_score = jnp.sum(rel * wr_ref[...], axis=-1, keepdims=True)  # [TB, 1]

    out = graph_score + rel_score + b_ref[...]               # [TB, 1]

    # Lane-dense (unmasked) store; wrapper slices column 0.
    out_ref[...] = jnp.broadcast_to(out, out_ref.shape)


def graph_classifier(node_repr, node_id, n_nodes, rel_labels, rel_table, fc_w, fc_b):
    Bq, Nq, Fq = node_repr.shape

    # --- wrapper-side layout plumbing (no compute of substance) -------------
    # Embedding lookup: tiny row gather, done outside the kernel.
    rel = rel_table[rel_labels[:, 0]]                        # [B, R]
    # Split/stack the FC weight into the three per-node segments + rel segment.
    w3 = jnp.stack([fc_w[0 * Fq:1 * Fq, 0],
                    fc_w[1 * Fq:2 * Fq, 0],
                    fc_w[2 * Fq:3 * Fq, 0]], axis=0)         # [3, F]
    wr = fc_w[3 * Fq:, 0][None, :]                           # [1, R]

    grid = (pl.cdiv(Bq, TB),)
    out = pl.pallas_call(
        graph_classifier_kernel,
        out_shape=jax.ShapeDtypeStruct((Bq, 128), jnp.float32),
        grid=grid,
        in_specs=[
            pl.BlockSpec((TB, Nq, Fq), lambda i: (i, 0, 0)),   # node repr
            pl.BlockSpec((TB, Nq), lambda i: (i, 0)),          # node ids
            pl.BlockSpec((TB, 1), lambda i: (i, 0)),           # node counts
            pl.BlockSpec((TB, R), lambda i: (i, 0)),           # gathered rel emb
            pl.BlockSpec((3, Fq), lambda i: (0, 0)),           # stacked W (g,h,t)
            pl.BlockSpec((1, R), lambda i: (0, 0)),            # W (rel segment)
            pl.BlockSpec((1, 1), lambda i: (0, 0)),            # bias
        ],
        out_specs=pl.BlockSpec((TB, 128), lambda i: (i, 0)),
        compiler_params=pltpu.CompilerParams(
            dimension_semantics=("parallel",)),
    )(node_repr, node_id.astype(jnp.int32), n_nodes.astype(jnp.int32),
      rel, w3, wr, fc_b)
    return out[:, :1]                                        # [B, 1]


def reference(node_repr, node_id, n_nodes, rel_labels, rel_table, fc_w, fc_b):
    Bq, Nq, Fq = node_repr.shape
    valid = (jnp.arange(Nq)[None, :] < n_nodes)              # [B, N] bool
    vmask = valid.astype(jnp.float32)[:, :, None]
    g_out = jnp.sum(node_repr * vmask, axis=1) / n_nodes.astype(jnp.float32)
    head = jnp.sum(node_repr * (valid & (node_id == 1)).astype(jnp.float32)[:, :, None], axis=1)
    tail = jnp.sum(node_repr * (valid & (node_id == 2)).astype(jnp.float32)[:, :, None], axis=1)
    rel = rel_table[rel_labels[:, 0]]
    g_rep = jnp.concatenate([g_out, head, tail, rel], axis=1)
    return g_rep @ fc_w + fc_b


if __name__ == "__main__":
    key = jax.random.PRNGKey(0)
    k_repr, k_rel, k_w, k_b = jax.random.split(key, 4)

    # deterministic synthetic "GNN output" node representations
    node_repr = jax.random.normal(k_repr, (B, N, F), dtype=jnp.float32)

    # node ids: node 0 of each graph is the head (id=1), node 1 the tail (id=2)
    node_id = jnp.zeros((B, N), dtype=jnp.int32)
    node_id = node_id.at[:, 0].set(1).at[:, 1].set(2)

    # actual per-graph node counts (DGL mean_nodes divides by these, not by N)
    n_nodes = jnp.array([[N], [N - 2], [N], [N - 3], [N - 1], [N], [N - 4], [N],
                         [N - 2], [N], [N - 1], [N], [N - 3], [N], [N], [N - 2]],
                        dtype=jnp.int32)                     # [B, 1]

    rel_labels = (jnp.arange(B, dtype=jnp.int32) % NUM_RELS)[:, None]  # [B, 1]

    # deterministic parameter init (nn.Embedding / nn.Linear shapes)
    rel_table = jax.random.normal(k_rel, (NUM_RELS, R), dtype=jnp.float32)
    fc_w = jax.random.normal(k_w, (FC_IN, 1), dtype=jnp.float32) * 0.1   # Linear weight^T
    fc_b = jax.random.normal(k_b, (1, 1), dtype=jnp.float32) * 0.1       # Linear bias

    out = graph_classifier(node_repr, node_id, n_nodes, rel_labels,
                           rel_table, fc_w, fc_b)
    out = jax.block_until_ready(out)

    ref = reference(node_repr, node_id, n_nodes, rel_labels,
                    rel_table, fc_w, fc_b)
    assert out.shape == (B, 1)
    assert jnp.allclose(out, ref, atol=1e-4, rtol=1e-4)
    print("KERNEL_OK")
</pallas_src>

<mosaic_0001>
module attributes {stable_mosaic.version = 11 : i64} {
  func.func @graph_classifier_kernel(%arg0: i32, %arg1: memref<8x8x32xf32, #tpu.memory_space<vmem>>, %arg2: memref<8x8xi32, #tpu.memory_space<vmem>>, %arg3: memref<8x1xi32, #tpu.memory_space<vmem>>, %arg4: memref<8x16xf32, #tpu.memory_space<vmem>>, %arg5: memref<3x32xf32, #tpu.memory_space<vmem>>, %arg6: memref<1x16xf32, #tpu.memory_space<vmem>>, %arg7: memref<1x1xf32, #tpu.memory_space<vmem>>, %arg8: memref<8x128xf32, #tpu.memory_space<vmem>>) attributes {dimension_semantics = [#tpu.dimension_semantics<parallel>], iteration_bounds = array<i64: 2>, scalar_prefetch = 0 : i64, scratch_operands = 0 : i64, tpu.core_type = #tpu.core_type<tc>, window_params = [{transform_indices = @transform_0, window_bounds = array<i64: 8, 8, 32>}, {transform_indices = @transform_1, window_bounds = array<i64: 8, 8>}, {transform_indices = @transform_2, window_bounds = array<i64: 8, 1>}, {transform_indices = @transform_3, window_bounds = array<i64: 8, 16>}, {pipeline_mode = #tpu.pipeline_mode<synchronous>, transform_indices = @transform_4, window_bounds = array<i64: 3, 32>}, {pipeline_mode = #tpu.pipeline_mode<synchronous>, transform_indices = @transform_5, window_bounds = array<i64: 1, 16>}, {pipeline_mode = #tpu.pipeline_mode<synchronous>, transform_indices = @transform_6, window_bounds = array<i64: 1, 1>}, {transform_indices = @transform_7, window_bounds = array<i64: 8, 128>}]} {
    %c0 = arith.constant 0 : index
    %c0_0 = arith.constant 0 : index
    %c0_1 = arith.constant 0 : index
    %0 = vector.load %arg1[%c0, %c0_0, %c0_1] : memref<8x8x32xf32, #tpu.memory_space<vmem>>, vector<8x8x32xf32>
    %c0_2 = arith.constant 0 : index
    %c0_3 = arith.constant 0 : index
    %1 = vector.load %arg2[%c0_2, %c0_3] : memref<8x8xi32, #tpu.memory_space<vmem>>, vector<8x8xi32>
    %c0_4 = arith.constant 0 : index
    %c0_5 = arith.constant 0 : index
    %2 = vector.load %arg3[%c0_4, %c0_5] : memref<8x1xi32, #tpu.memory_space<vmem>>, vector<8x1xi32>
    %c0_6 = arith.constant 0 : index
    %c0_7 = arith.constant 0 : index
    %3 = vector.load %arg4[%c0_6, %c0_7] : memref<8x16xf32, #tpu.memory_space<vmem>>, vector<8x16xf32>
    %4 = tpu.iota {dimensions = array<i32: 1>} : vector<8x8xi32>
    %5 = vector.broadcast %2 : vector<8x1xi32> to vector<8x8xi32>
    %6 = arith.cmpi slt, %4, %5 : vector<8x8xi32>
    %7 = arith.sitofp %2 : vector<8x1xi32> to vector<8x1xf32>
    %cst = arith.constant 1.000000e+00 : f32
    %8 = vector.broadcast %cst : f32 to vector<8x1xf32>
    %9 = arith.divf %8, %7 : vector<8x1xf32>
    %cst_8 = arith.constant 0.000000e+00 : f32
    %10 = vector.shape_cast %9 : vector<8x1xf32> to vector<8x1xf32>
    %11 = vector.broadcast %10 : vector<8x1xf32> to vector<8x8xf32>
    %12 = vector.broadcast %cst_8 : f32 to vector<8x8xf32>
    %13 = arith.select %6, %11, %12 : vector<8x8xi1>, vector<8x8xf32>
    %c1_i32 = arith.constant 1 : i32
    %14 = vector.broadcast %c1_i32 : i32 to vector<8x8xi32>
    %15 = arith.cmpi eq, %1, %14 : vector<8x8xi32>
    %16 = arith.andi %6, %15 : vector<8x8xi1>
    %cst_9 = arith.constant 1.000000e+00 : f32
    %cst_10 = arith.constant 0.000000e+00 : f32
    %17 = vector.broadcast %cst_9 : f32 to vector<8x8xf32>
    %18 = vector.broadcast %cst_10 : f32 to vector<8x8xf32>
    %19 = arith.select %16, %17, %18 : vector<8x8xi1>, vector<8x8xf32>
    %c2_i32 = arith.constant 2 : i32
    %20 = vector.broadcast %c2_i32 : i32 to vector<8x8xi32>
    %21 = arith.cmpi eq, %1, %20 : vector<8x8xi32>
    %22 = arith.andi %6, %21 : vector<8x8xi1>
    %cst_11 = arith.constant 1.000000e+00 : f32
    %cst_12 = arith.constant 0.000000e+00 : f32
    %23 = vector.broadcast %cst_11 : f32 to vector<8x8xf32>
    %24 = vector.broadcast %cst_12 : f32 to vector<8x8xf32>
    %25 = arith.select %22, %23, %24 : vector<8x8xi1>, vector<8x8xf32>
    %c0_13 = arith.constant 0 : index
    %c0_14 = arith.constant 0 : index
    %26 = vector.load %arg5[%c0_13, %c0_14] : memref<3x32xf32, #tpu.memory_space<vmem>>, vector<1x32xf32>
    %c1 = arith.constant 1 : index
    %c0_15 = arith.constant 0 : index
    %27 = vector.load %arg5[%c1, %c0_15] : memref<3x32xf32, #tpu.memory_space<vmem>>, vector<1x32xf32>
    %c2 = arith.constant 2 : index
    %c0_16 = arith.constant 0 : index
    %28 = vector.load %arg5[%c2, %c0_16] : memref<3x32xf32, #tpu.memory_space<vmem>>, vector<1x32xf32>
    %29 = vector.shape_cast %26 : vector<1x32xf32> to vector<1x1x32xf32>
    %30 = vector.broadcast %29 : vector<1x1x32xf32> to vector<8x8x32xf32>
    %31 = arith.mulf %0, %30 : vector<8x8x32xf32>
    %cst_17 = arith.constant dense<0.000000e+00> : vector<8x8xf32>
    %32 = vector.multi_reduction <add>, %31, %cst_17 [2] : vector<8x8x32xf32> to vector<8x8xf32>
    %33 = vector.shape_cast %27 : vector<1x32xf32> to vector<1x1x32xf32>
    %34 = vector.broadcast %33 : vector<1x1x32xf32> to vector<8x8x32xf32>
    %35 = arith.mulf %0, %34 : vector<8x8x32xf32>
    %cst_18 = arith.constant dense<0.000000e+00> : vector<8x8xf32>
    %36 = vector.multi_reduction <add>, %35, %cst_18 [2] : vector<8x8x32xf32> to vector<8x8xf32>
    %37 = vector.shape_cast %28 : vector<1x32xf32> to vector<1x1x32xf32>
    %38 = vector.broadcast %37 : vector<1x1x32xf32> to vector<8x8x32xf32>
    %39 = arith.mulf %0, %38 : vector<8x8x32xf32>
    %cst_19 = arith.constant dense<0.000000e+00> : vector<8x8xf32>
    %40 = vector.multi_reduction <add>, %39, %cst_19 [2] : vector<8x8x32xf32> to vector<8x8xf32>
    %41 = arith.mulf %13, %32 : vector<8x8xf32>
    %42 = arith.mulf %19, %36 : vector<8x8xf32>
    %43 = arith.addf %41, %42 : vector<8x8xf32>
    %44 = arith.mulf %25, %40 : vector<8x8xf32>
    %45 = arith.addf %43, %44 : vector<8x8xf32>
    %cst_20 = arith.constant dense<0.000000e+00> : vector<8xf32>
    %46 = vector.multi_reduction <add>, %45, %cst_20 [1] : vector<8x8xf32> to vector<8xf32>
    %47 = vector.shape_cast %46 : vector<8xf32> to vector<8x1xf32>
    %c0_21 = arith.constant 0 : index
    %c0_22 = arith.constant 0 : index
    %48 = vector.load %arg6[%c0_21, %c0_22] : memref<1x16xf32, #tpu.memory_space<vmem>>, vector<1x16xf32>
    %49 = vector.broadcast %48 : vector<1x16xf32> to vector<8x16xf32>
    %50 = arith.mulf %3, %49 : vector<8x16xf32>
    %cst_23 = arith.constant dense<0.000000e+00> : vector<8xf32>
    %51 = vector.multi_reduction <add>, %50, %cst_23 [1] : vector<8x16xf32> to vector<8xf32>
    %52 = vector.shape_cast %51 : vector<8xf32> to vector<8x1xf32>
    %53 = arith.addf %47, %52 : vector<8x1xf32>
    %c0_24 = arith.constant 0 : index
    %c0_25 = arith.constant 0 : index
    %54 = vector.load %arg7[%c0_24, %c0_25] : memref<1x1xf32, #tpu.memory_space<vmem>>, vector<1x1xf32>
    %55 = vector.broadcast %54 : vector<1x1xf32> to vector<8x1xf32>
    %56 = arith.addf %53, %55 : vector<8x1xf32>
    %57 = vector.shape_cast %56 : vector<8x1xf32> to vector<8x1xf32>
    %58 = vector.broadcast %57 : vector<8x1xf32> to vector<8x128xf32>
    %c0_26 = arith.constant 0 : index
    %c0_27 = arith.constant 0 : index
    %59 = vector.load %arg8[%c0_26, %c0_27] : memref<8x128xf32, #tpu.memory_space<vmem>>, vector<8x128xf32>
    tpu.vector_store %arg8[%c0_26, %c0_27], %58 {strides = array<i32>} : memref<8x128xf32, #tpu.memory_space<vmem>>, vector<8x128xf32>,
    return
  }
  func.func @transform_0(%arg0: i32) -> (i32, i32, i32) {
    %c0_i32 = arith.constant 0 : i32
    %c0_i32_0 = arith.constant 0 : i32
    %c0_i32_1 = arith.constant 0 : i32
    return %arg0, %c0_i32, %c0_i32_0 : i32, i32, i32
  }
  func.func @transform_1(%arg0: i32) -> (i32, i32) {
    %c0_i32 = arith.constant 0 : i32
    %c0_i32_0 = arith.constant 0 : i32
    return %arg0, %c0_i32 : i32, i32
  }
  func.func @transform_2(%arg0: i32) -> (i32, i32) {
    %c0_i32 = arith.constant 0 : i32
    %c0_i32_0 = arith.constant 0 : i32
    return %arg0, %c0_i32 : i32, i32
  }
  func.func @transform_3(%arg0: i32) -> (i32, i32) {
    %c0_i32 = arith.constant 0 : i32
    %c0_i32_0 = arith.constant 0 : i32
    return %arg0, %c0_i32 : i32, i32
  }
  func.func @transform_4(%arg0: i32) -> (i32, i32) {
    %c0_i32 = arith.constant 0 : i32
    %c0_i32_0 = arith.constant 0 : i32
    %c0_i32_1 = arith.constant 0 : i32
    return %c0_i32, %c0_i32_0 : i32, i32
  }
  func.func @transform_5(%arg0: i32) -> (i32, i32) {
    %c0_i32 = arith.constant 0 : i32
    %c0_i32_0 = arith.constant 0 : i32
    %c0_i32_1 = arith.constant 0 : i32
    return %c0_i32, %c0_i32_0 : i32, i32
  }
  func.func @transform_6(%arg0: i32) -> (i32, i32) {
    %c0_i32 = arith.constant 0 : i32
    %c0_i32_0 = arith.constant 0 : i32
    %c0_i32_1 = arith.constant 0 : i32
    return %c0_i32, %c0_i32_0 : i32, i32
  }
  func.func @transform_7(%arg0: i32) -> (i32, i32) {
    %c0_i32 = arith.constant 0 : i32
    %c0_i32_0 = arith.constant 0 : i32
    return %arg0, %c0_i32 : i32, i32
  }
}

</mosaic_0001>

<bundles_post_ra>
// kernel: tpu_custom_call.1
= control target key start
LH: loop header
LB: loop body
LE: loop exit
PB: predicated region body
PF: predicated region fallthrough
CT: control target
= control target key end

     0   :  { %s1229_s0 = inlined_call_operand.hbm [shape: f32[16,8,32], index: 0, kind: input, shape index: {}]   ;;  %s1230_s1 = inlined_call_operand.vmem [shape: s32[16,8], index: 1, kind: input, shape index: {}]   ;;  %s1231_s2 = inlined_call_operand.vmem [shape: s32[16,1], index: 2, kind: input, shape index: {}]   ;;  %s1232_s3 = inlined_call_operand.vmem [shape: f32[16,16], index: 3, kind: input, shape index: {}]   ;;  %s1233_s4 = inlined_call_operand.vmem [shape: f32[3,32], index: 4, kind: input, shape index: {}]   ;;  %s1234_s5 = inlined_call_operand.vmem [shape: f32[1,16], index: 5, kind: input, shape index: {}]   ;;  %s1235_s6 = inlined_call_operand.<no memory space> [shape: f32[1,1], index: 6, kind: input, shape index: {}]   ;;  %s1236_s7 = inlined_call_operand.hbm [shape: f32[16,128], index: 7, kind: output, shape index: {}]  }
   0x1   :  { %v12_v0 = vstv %s1235_s6 }
   0x2   :  { %13 = vst [vmem:[#allocation2] sm:$0x1] %v12_v0 }
   0x3   :  { %14 = vsyncpa [#allocation4], 0 }
   0x4   :  { %16 = vsyncpa [#allocation4 + $0x1], 0 }
   0x5   :  { %17 = vsyncpa [#allocation5], 0 }
   0x6   :  { %19 = vsyncpa [#allocation5 + $0x1], 0  ;;  %s954_s26 = smov 0   ;;  %s956_s27 = smov 0  }
   0x7   :  { %s958_s28 = smov 0   ;;  %s960_s29 = smov 0  }
   0x8 LB: > { %s975_s6 = sadd.s32 4294967295, %s905_s29   ;;  %s732_s30 = sadd.s32 4294967294, %s905_s29   ;;  %s905_s29 = sphi %s960_s29, %s1246_s29   ;;  %s901_s28 = sphi %s958_s28, %s1245_s28   ;;  %s897_s27 = sphi %s956_s27, %s1244_s27   ;;  %s893_s26 = sphi %s954_s26, %s1243_s26  }
   0x9   : > { %s979_s8 = sadd.s32 1, %s905_s29   ;;  %s32_s9 = sadd.s32 1, %s901_s28 }
   0xa   : > { %s29_s10 = ssub.s32 %s905_s29, %s979_s8  ;;  %p39_p0 = scmp.ne.s32.totalorder %s901_s28, %s897_s27 }
   0xb   : > { %p30_p1 = scmp.eq.s32.totalorder %s29_s10, 0  ;;  %p40_p2 = scmp.eq.s32.totalorder %s905_s29, 0 }
   0xc   : > { %p45_p3 = scmp.ne.s32.totalorder %s897_s27, %s893_s26  ;;  %p46_p4 = scmp.eq.s32.totalorder %s975_s6, 0 }
   0xd   : > { %s991_s11 = scalar_select %p30_p1, %s901_s28, %s32_s9  }
   0xe   : > { %p993_p5 = por %p40_p2, %p39_p0  ;;  %p997_p6 = por %p46_p4, %p45_p3 }
   0xf   : > { %p210_p7 = scmp.eq.s32.totalorder %s975_s6, 1  ;;  %p216_p8 = scmp.eq.s32.totalorder %s732_s30, 1 }
  0x10   : > { %p761_p10 = scmp.lt.s32.totalorder %s905_s29, 2  ;;  %s245_s16 = sand.u32 1, %s901_s28  }
  0x11   : > { %p1004_p11 = por %p210_p7, %p39_p0  ;;  %p1008_p12 = por %p216_p8, %p45_p3 }
  0x12   : > { %s748_s17 = sshll.u32 %s905_s29, 6  ;;  %s735_s18 = sshll.u32 %s245_s16, 6 }
  0x13   : > { %s254_s21 = scalar_lea.hbm %s1229_s0, %s748_s17  ;;  %s249_s23 = scalar_lea.vmem [#allocation3], %s735_s18 }
  0x14   : > { %s255_s22 = sshll.u32 %s254_s21, 4  ;;  %s257_s24 = sshll.u32 %s249_s23, 4  ;;  %s256_s22 = int_to_ptr.hbm [resolvable:$true] %s255_s22  ;;  %s258_s24 = int_to_ptr.vmem [resolvable:$true] %s257_s24 }
  0x15   : > { %p1019_p13 = pnand %p761_p10, %p993_p5  ;;  %p738_p0 = scmp.ge.s32.totalorder %s905_s29, 1 }
  0x16   : > { %p286_p1 = scmp.lt.s32.totalorder %s905_s29, 3  ;;  %s246_s30 = scalar_lea.sflag [#allocation4], %s245_s16 }
  0x17   : > { %s809_s9 = sshra.s32 %s256_s22, 4  ;;  %p813_p3 = pneg %p1019_p13  ;;  %s810_s9 = int_to_ptr.hbm [resolvable:$true] %s809_s9 }
  0x18   : > { %s811_s10 = scalar_lea.hbm %s810_s9, 64  ;;  %s816_s12 = scalar_lea.hbm %s1229_s0, 128 }
  0x19   : > { %p812_p2 = scmp.ne.s32.totalorder %s810_s9, %s811_s10  ;;  %p817_p5 = scmp.lt.s32.totalorder %s810_s9, %s1229_s0 }
  0x1a   : > { %p818_p8 = scmp.lt.s32.totalorder %s816_s12, %s811_s10 }
  0x1b   : > { %p814_p4 = pnand %p813_p3, %p812_p2 }
  0x1c   : > { %p819_p10 = por %p818_p8, %p817_p5 }
  0x1d   : > { %p815_p7 = pneg %p814_p4 }
  0x1f   : > { %p820_p9 = pnand %p819_p10, %p815_p7 }
  0x21   : > { %823 = shalt.err (!%p820_p9)
}
  0x22   : > { %s907_s16 = smov 128   ;;  %s908_s21 = smov 8  }
  0x23   : > { %756 = dma.hbm_to_vmem [thread:$0]  (!%p1019_p13), %s256_s22, 1024, %s258_s24, %s246_s30, %s907_s16, %s907_s16, %s908_s21  }
  0x24   : > { %p287_p2 = pnand %p738_p0, %p286_p1 }
  0x25   : > { %s1040_s23 = sand.u32 (!%p287_p2), 1, %s897_s27  }
  0x26   : > { %290 = sbr.rel (%p287_p2) target bundleno = 494 (0x1ee), region = 48  ;;  %s739_s9 = sshll.u32 (!%p287_p2), %s1040_s23, 6 }
  0x27   : > { %s293_s10 = scalar_lea.sflag (!%p287_p2), [#allocation4], %s1040_s23  ;;  %s1044_s17 = scalar_lea.vmem (!%p287_p2), [#allocation3], %s739_s9 }
  0x2b   : > { %884 = dma.done.wait (%p997_p6), %s293_s10, 1024  }
  0x2c   : > { %886 = vsyncadd (%p997_p6), %s293_s10, 4294966272  ;;  %v355_v1 = vld [vmem:[%s1044_s17 + $0x10] sm:$0xff]  ;;  %v1054_v2 = vld [vmem:[%s1233_s4] ss:$0 sm:$0xff]  ;;  %vm410_vm0 = vcmask 261120   ;;  %p341_p6 = scmp.lt.s32.totalorder %s975_s6, 1 }
  0x2d   : > { %v353_v3 = vld [vmem:[%s1044_s17] sm:$0xff]  ;;  %v404_v5 = vmul.f32 %v1054_v2, %v355_v1  ;;  %v354_v8 = vld [vmem:[%s1044_s17 + $0x8] sm:$0xff]  ;;  %v356_v19 = vld [vmem:[%s1044_s17 + $0x18] sm:$0xff]  ;;  %v909_v43 = vmov 0   ;;  %vm517_vm5 = vcmask 1041409   ;;  %vm519_vm6 = vcmask 1042434  }
  0x2e   : > { %v1060_v4 = vld [vmem:[%s1233_s4 + $0x1] ss:$0 sm:$0xff]  ;;  %v402_v6 = vmul.f32 %v1054_v2, %v353_v3  ;;  %v403_v13 = vmul.f32 %v1054_v2, %v354_v8  ;;  %v1077_v17 = vld [vmem:[%s1233_s4 + $0x2] ss:$0 sm:$0xff]  ;;  %v405_v21 = vmul.f32 %v1054_v2, %v356_v19  ;;  %v358_v33 = vld [vmem:[%s1044_s17 + $0x28] sm:$0xff]  ;;  %800 = vset.pattern.permute.xlu2 %v909_v43  ;;  %799 = vset.pattern.permute.xlu1 %v909_v43  ;;  %s342_s12 = scalar_select %p341_p6, %s975_s6, 1 }
  0x2f   : > { %v436_v7 = vmul.f32 %v1060_v4, %v353_v3  ;;  %v417_v9 = vsel %vm410_vm0, %v404_v5, 0.0  ;;  %v438_v12 = vmul.f32 %v1060_v4, %v355_v1  ;;  %v437_v14 = vmul.f32 %v1060_v4, %v354_v8  ;;  %v357_v26 = vld [vmem:[%s1044_s17 + $0x20] sm:$0xff]  ;;  %v359_v40 = vld [vmem:[%s1044_s17 + $0x30] sm:$0xff]  ;;  %801 = vset.pattern.permute.xlu0 %v909_v43  ;;  %v360_v48 = vld [vmem:[%s1044_s17 + $0x38] sm:$0xff]  ;;  %s740_s18 = sshll.u32 %s1040_s23, 3  ;;  %s859_s30 = scalar_lea.hbm %s1236_s7, 16 }
  0x30   : > { %v411_v10 = vsel %vm410_vm0, %v402_v6, 0.0  ;;  %418 = vadd.xlane.f32.xlu2 %v417_v9  ;;  %v414_v16 = vsel %vm410_vm0, %v403_v13, 0.0  ;;  %v469_v20 = vmul.f32 %v1077_v17, %v353_v3  ;;  %v439_v22 = vmul.f32 %v1060_v4, %v356_v19  ;;  %s1111_s19 = sshll.u32 %s342_s12, 3  ;;  %s745_s12 = sshll.u32 %s975_s6, 3 }
  0x31   : > { %v444_v11 = vsel %vm410_vm0, %v436_v7, 0.0  ;;  %412 = vadd.xlane.f32.xlu0 %v411_v10  ;;  %v450_v15 = vsel %vm410_vm0, %v438_v12, 0.0  ;;  %v447_v18 = vsel %vm410_vm0, %v437_v14, 0.0  ;;  %v420_v24 = vsel %vm410_vm0, %v405_v21, 0.0  ;;  %s348_s21 = scalar_lea.vmem %s1231_s2, %s1111_s19  ;;  %s344_s17 = scalar_lea.vmem %s1230_s1, %s1111_s19 }
  0x32   : > { %445 = vadd.xlane.f32.xlu1 %v444_v11  ;;  %v477_v23 = vsel %vm410_vm0, %v469_v20, 0.0  ;;  %v453_v25 = vsel %vm410_vm0, %v439_v22, 0.0  ;;  %v440_v27 = vmul.f32 %v1060_v4, %v357_v26  ;;  %v470_v28 = vmul.f32 %v1077_v17, %v354_v8  ;;  %v362_v52 = vld [vmem:[%s348_s21] sm:$0xff]  ;;  %s352_s25 = scalar_lea.vmem %s1232_s3, %s1111_s19  ;;  %s621_s16 = scalar_lea.hbm %s1236_s7, %s745_s12 }
  0x33   : > { %v406_v29 = vmul.f32 %v1054_v2, %v357_v26  ;;  %v441_v34 = vmul.f32 %v1060_v4, %v358_v33  ;;  %v471_v35 = vmul.f32 %v1077_v17, %v355_v1  ;;  %v407_v36 = vmul.f32 %v1054_v2, %v358_v33  ;;  %s339_s21 = scalar_lea.vmem [#allocation6], %s740_s18  ;;  %s625_s10 = sshll.u32 %s621_s16, 4  ;;  %s626_s10 = int_to_ptr.hbm [resolvable:$true] %s625_s10 }
  0x34   : > { %v456_v30 = vsel %vm410_vm0, %v440_v27, 0.0  ;;  %v480_v31 = vsel %vm410_vm0, %v470_v28, 0.0  ;;  %v442_v41 = vmul.f32 %v1060_v4, %v359_v40  ;;  %v472_v42 = vmul.f32 %v1077_v17, %v356_v19  ;;  %s623_s9 = sshll.u32 %s339_s21, 4  ;;  %s853_s22 = sshra.s32 %s626_s10, 4  ;;  %s624_s9 = int_to_ptr.vmem [resolvable:$true] %s623_s9  ;;  %s854_s22 = int_to_ptr.hbm [resolvable:$true] %s853_s22 }
  0x35   : > { %v423_v32 = vsel %vm410_vm0, %v406_v29, 0.0  ;;  %v459_v37 = vsel %vm410_vm0, %v441_v34, 0.0  ;;  %v483_v38 = vsel %vm410_vm0, %v471_v35, 0.0  ;;  %v426_v39 = vsel %vm410_vm0, %v407_v36, 0.0  ;;  %s855_s24 = scalar_lea.hbm %s854_s22, 8  ;;  %p860_p1 = scmp.lt.s32.totalorder %s854_s22, %s1236_s7 }
  0x36   : > { %v408_v44 = vmul.f32 %v1054_v2, %v359_v40  ;;  %v462_v45 = vsel %vm410_vm0, %v442_v41, 0.0  ;;  %v486_v46 = vsel %vm410_vm0, %v472_v42, 0.0  ;;  %v443_v49 = vmul.f32 %v1060_v4, %v360_v48  ;;  %p856_p9 = scmp.ne.s32.totalorder %s854_s22, %s855_s24  ;;  %p861_p3 = scmp.lt.s32.totalorder %s859_s30, %s855_s24 }
  0x37   : > { %v473_v50 = vmul.f32 %v1077_v17, %v357_v26  ;;  %v409_v51 = vmul.f32 %v1054_v2, %v360_v48  ;;  %v370_v55 = vcvt.s32.f32 %v362_v52  ;;  %v474_v57 = vmul.f32 %v1077_v17, %v358_v33 }
  0x38   : > { %451 = vadd.xlane.f32.xlu2 %v450_v15  ;;  %v429_v47 = vsel %vm410_vm0, %v408_v44, 0.0  ;;  %v465_v53 = vsel %vm410_vm0, %v443_v49, 0.0  ;;  %v475_v58 = vmul.f32 %v1077_v17, %v359_v40  ;;  %v476_v62 = vmul.f32 %v1077_v17, %v360_v48  ;;  %p857_p13 = pnand %p856_p9, %p1004_p11  ;;  %p862_p4 = por %p861_p3, %p860_p1 }
  0x39   : > { %415 = vadd.xlane.f32.xlu0 %v414_v16  ;;  %v489_v54 = vsel %vm410_vm0, %v473_v50, 0.0  ;;  %v432_v56 = vsel %vm410_vm0, %v409_v51, 0.0  ;;  %807 = vrcp.f32 %v370_v55  ;;  %v492_v59 = vsel %vm410_vm0, %v474_v57, 0.0 }
  0x3a   : > { %448 = vadd.xlane.f32.xlu1 %v447_v18  ;;  %v495_v60 = vsel %vm410_vm0, %v475_v58, 0.0  ;;  %v498_v0 = vsel %vm410_vm0, %v476_v62, 0.0  ;;  %vm376_vm1 = vweird.f32 %v370_v55  ;;  %v382_v3 = vand.u32 2147483648, %v370_v55  ;;  %v361_v58 = vld [vmem:[%s344_s17] sm:$0xff]  ;;  %s611_s17 = scalar_lea.sflag [#allocation5], %s1040_s23  ;;  %p858_p0 = pneg %p857_p13 }
  0x3b   : > { %v380_v5 = vand.u32 2147483647, %v370_v55  ;;  %v364_v27 = vlaneseq  ;;  %vm521_vm7 = vcmask 1043459   ;;  %vm523_vm8 = vcmask 1044484  }
  0x3c   : > { %v383_v6 = vor.u32 1.1754944e-38, %v382_v3  ;;  %vm525_vm9 = vcmask 1045509   ;;  %vm527_vm10 = vcmask 1046534   ;;  %vm529_vm11 = vcmask 1047559   ;;  %p863_p7 = pnand %p862_p4, %p858_p0 }
  0x3d   : > { %vm381_vm4 = vcmp.eq.f32.partialorder %v380_v5, 8.507059e+37  ;;  %vm392_vm12 = vcmp.eq.s32.totalorder %v361_v58, 1  ;;  %vm395_vm13 = vcmp.eq.s32.totalorder %v361_v58, 2 }
  0x3f   : > { %v808_v61 = vpop.eup %807 }
  0x40   : > { %478 = vadd.xlane.f32.xlu2 %v477_v23  ;;  %v372_v63 = vmul.f32 %v808_v61, %v370_v55  ;;  %vm377_vm2 = vweird.f32 %v808_v61 }
  0x41   : > { %421 = vadd.xlane.f32.xlu0 %v420_v24  ;;  %vm378_vm3 = vmor %vm376_vm1, %vm377_vm2  ;;  %vm585_vm1 = vcmask 64512   ;;  %vm594_vm2 = vcmask 130048  }
  0x42   : > { %454 = vadd.xlane.f32.xlu1 %v453_v25  ;;  %v373_v1 = vsub.f32 1.0, %v372_v63 }
  0x44   : > { %v374_v2 = vmul.f32 %v808_v61, %v373_v1 }
  0x46   : > { %v375_v4 = vadd.f32 %v808_v61, %v374_v2 }
  0x48   : > { %457 = vadd.xlane.f32.xlu2 %v456_v30  ;;  %v379_v7 = vsel %vm378_vm3, %v808_v61, %v375_v4  ;;  %v1133_v30 = vand.u32 127, %v364_v27 }
  0x49   : > { %481 = vadd.xlane.f32.xlu0 %v480_v31  ;;  %v384_v8 = vsel %vm381_vm4, %v383_v6, %v379_v7 }
  0x4a   : > { %424 = vadd.xlane.f32.xlu1 %v423_v32 }
  0x50   : > { %460 = vadd.xlane.f32.xlu2 %v459_v37 }
  0x51   : > { %484 = vadd.xlane.f32.xlu0 %v483_v38 }
  0x52   : > { %427 = vadd.xlane.f32.xlu1 %v426_v39 }
  0x58   : > { %463 = vadd.xlane.f32.xlu2 %v462_v45 }
  0x59   : > { %487 = vadd.xlane.f32.xlu0 %v486_v46 }
  0x5a   : > { %430 = vadd.xlane.f32.xlu1 %v429_v47 }
  0x60   : > { %466 = vadd.xlane.f32.xlu2 %v465_v53 }
  0x61   : > { %490 = vadd.xlane.f32.xlu0 %v489_v54 }
  0x62   : > { %433 = vadd.xlane.f32.xlu1 %v432_v56 }
  0x68   : > { %496 = vadd.xlane.f32.xlu2 %v495_v60 }
  0x69   : > { %493 = vadd.xlane.f32.xlu0 %v492_v59 }
  0x71   : > { %499 = vadd.xlane.f32.xlu0 %v498_v0 }
  0x7b   : > { %367 = vperm.xlu1 %799, %v362_v52  }
  0x80   : > { %388 = vperm.xlu2 %800, %v384_v8  }
  0xa3   : > { %v419_v9 = vpop.xlane.xlu2 %418 }
  0xa4   : > { %v413_v10 = vpop.xlane.xlu0 %412  ;;  %v511_v36 = vperm.slane %v419_v9, %v1133_v30 }
  0xa5   : > { %v446_v11 = vpop.xlane.xlu1 %445  ;;  %v509_v31 = vperm.slane %v413_v10, %v1133_v30 }
  0xa6   : > { %v541_v35 = vperm.slane %v446_v11, %v1133_v30 }
  0xab   : > { %v452_v12 = vpop.xlane.xlu2 %451 }
  0xac   : > { %v416_v13 = vpop.xlane.xlu0 %415  ;;  %v543_v37 = vperm.slane %v452_v12, %v1133_v30 }
  0xad   : > { %v449_v14 = vpop.xlane.xlu1 %448  ;;  %v510_v33 = vperm.slane %v416_v13, %v1133_v30 }
  0xae   : > { %v542_v32 = vperm.slane %v449_v14, %v1133_v30 }
  0xaf   : > { %v518_v39 = vsel %vm517_vm5, %v510_v33, %v509_v31 }
  0xb0   : > { %v549_v38 = vsel %vm517_vm5, %v542_v32, %v541_v35  ;;  %v520_v49 = vsel %vm519_vm6, %v511_v36, %v518_v39 }
  0xb1   : > { %v550_v48 = vsel %vm519_vm6, %v543_v37, %v549_v38 }
  0xb3   : > { %v479_v15 = vpop.xlane.xlu2 %478 }
  0xb4   : > { %v422_v16 = vpop.xlane.xlu0 %421  ;;  %v567_v45 = vperm.slane %v479_v15, %v1133_v30 }
  0xb5   : > { %v455_v19 = vpop.xlane.xlu1 %454  ;;  %v512_v41 = vperm.slane %v422_v16, %v1133_v30 }
  0xb6   : > { %v544_v40 = vperm.slane %v455_v19, %v1133_v30 }
  0xb7   : > { %v522_v52 = vsel %vm521_vm7, %v512_v41, %v520_v49 }
  0xb8   : > { %v551_v51 = vsel %vm521_vm7, %v544_v40, %v550_v48 }
  0xbb   : > { %v458_v17 = vpop.xlane.xlu2 %457 }
  0xbc   : > { %v482_v18 = vpop.xlane.xlu0 %481  ;;  %v545_v43 = vperm.slane %v458_v17, %v1133_v30 }
  0xbd   : > { %v425_v22 = vpop.xlane.xlu1 %424  ;;  %v568_v47 = vperm.slane %v482_v18, %v1133_v30  ;;  %v910_v18 = vmov 0.0  }
  0xbe   : > { %v513_v46 = vperm.slane %v425_v22, %v1133_v30  ;;  %v552_v54 = vsel %vm523_vm8, %v545_v43, %v551_v51 }
  0xbf   : > { %v575_v60 = vsel %vm517_vm5, %v568_v47, %v567_v45 }
  0xc0   : > { %v524_v59 = vsel %vm523_vm8, %v513_v46, %v522_v52 }
  0xc3   : > { %v461_v21 = vpop.xlane.xlu2 %460 }
  0xc4   : > { %v485_v20 = vpop.xlane.xlu0 %484  ;;  %v546_v55 = vperm.slane %v461_v21, %v1133_v30 }
  0xc5   : > { %v428_v25 = vpop.xlane.xlu1 %427  ;;  %v569_v50 = vperm.slane %v485_v20, %v1133_v30 }
  0xc6   : > { %v514_v56 = vperm.slane %v428_v25, %v1133_v30  ;;  %v553_v6 = vsel %vm525_vm9, %v546_v55, %v552_v54 }
  0xc7   : > { %v576_v63 = vsel %vm519_vm6, %v569_v50, %v575_v60 }
  0xc8   : > { %v526_v7 = vsel %vm525_vm9, %v514_v56, %v524_v59 }
  0xcb   : > { %v1129_v24 = vpop.xlane.xlu2 %463 }
  0xcc   : > { %v488_v23 = vpop.xlane.xlu0 %487  ;;  %v547_v0 = vperm.slane %v1129_v24, %v1133_v30 }
  0xcd   : > { %v431_v29 = vpop.xlane.xlu1 %430  ;;  %v570_v53 = vperm.slane %v488_v23, %v1133_v30 }
  0xce   : > { %v515_v61 = vperm.slane %v431_v29, %v1133_v30  ;;  %v554_v14 = vsel %vm527_vm10, %v547_v0, %v553_v6  ;;  %v363_v29 = vld [vmem:[%s352_s25] sm:$0xff] }
  0xcf   : > { %v577_v3 = vsel %vm521_vm7, %v570_v53, %v576_v63 }
  0xd0   : > { %v528_v13 = vsel %vm527_vm10, %v515_v61, %v526_v7 }
  0xd3   : > { %v1131_v28 = vpop.xlane.xlu2 %466 }
  0xd4   : > { %v491_v26 = vpop.xlane.xlu0 %490  ;;  %v548_v4 = vperm.slane %v1131_v28, %v1133_v30  ;;  %v805_v28 = vld [vmem:[%s1234_s5] ss:$0 sm:$0xff] }
  0xd5   : > { %v434_v44 = vpop.xlane.xlu1 %433  ;;  %v571_v57 = vperm.slane %v491_v26, %v1133_v30  ;;  %v593_v31 = vmul.f32 %v805_v28, %v363_v29 }
  0xd6   : > { %v516_v1 = vperm.slane %v434_v44, %v1133_v30  ;;  %v555_v17 = vsel %vm529_vm11, %v548_v4, %v554_v14 }
  0xd7   : > { %v578_v8 = vsel %vm523_vm8, %v571_v57, %v577_v3  ;;  %v595_v32 = vsel %vm594_vm2, %v593_v31, 0.0 }
  0xd8   : > { %v530_v16 = vsel %vm529_vm11, %v516_v1, %v528_v13 }
  0xdb   : > { %v497_v42 = vpop.xlane.xlu2 %496 }
  0xdc   : > { %v494_v34 = vpop.xlane.xlu0 %493  ;;  %v573_v9 = vperm.slane %v497_v42, %v1133_v30 }
  0xdd   : > { %v572_v62 = vperm.slane %v494_v34, %v1133_v30  ;;  %v806_v34 = vld [vmem:[#allocation2] ss:$0 sm:$0xff] }
  0xdf   : > { %v579_v11 = vsel %vm525_vm9, %v572_v62, %v578_v8 }
  0xe0   : > { %v580_v21 = vsel %vm527_vm10, %v573_v9, %v579_v11 }
  0xe3   : > { %v389_v5 = vpop.permute.xlu2 %388 }
  0xe4   : > { %v500_v2 = vpop.xlane.xlu0 %499 }
  0xe5   : > { %v574_v12 = vperm.slane %v500_v2, %v1133_v30 }
  0xe7   : > { %v581_v24 = vsel %vm529_vm11, %v574_v12, %v580_v21 }
  0xed   : > { %v368_v10 = vpop.permute.xlu1 %367 }
  0xee   : > { %vm369_vm14 = vcmp.lt.s32.totalorder %v1133_v30, %v368_v10 }
  0xef   : > { %vm393_vm15 = vmand %vm369_vm14, %vm392_vm12  ;;  %v391_v15 = vsel %vm369_vm14, %v389_v5, 0.0 }
  0xf0   : > { %v394_v19 = vsel %vm393_vm15, 1.0, %v910_v18  ;;  %vm396_vm0 = vmand %vm369_vm14, %vm395_vm13  ;;  %v532_v20 = vmul.f32 %v530_v16, %v391_v15 }
  0xf1   : > { %v397_v22 = vsel %vm396_vm0, 1.0, %v910_v18  ;;  %v557_v23 = vmul.f32 %v555_v17, %v394_v19 }
  0xf2   : > { %v583_v26 = vmul.f32 %v581_v24, %v397_v22 }
  0xf3   : > { %v558_v25 = vadd.f32 %v557_v23, %v532_v20 }
  0xf5   : > { %v584_v27 = vadd.f32 %v583_v26, %v558_v25 }
  0xf7   : > { %v586_v30 = vsel %vm585_vm1, %v584_v27, 0.0 }
  0xf8   : > { %587 = vadd.xlane.f32.xlu0 %v586_v30 }
 0x100   : > { %596 = vadd.xlane.f32.xlu0 %v595_v32 }
 0x16b   : > { %v588_v33 = vpop.xlane.xlu0 %587 }
 0x173   : > { %v597_v35 = vpop.xlane.xlu0 %596 }
 0x174   : > { %v598_v36 = vadd.f32 %v597_v35, %v588_v33 }
 0x176   : > { %v603_v37 = vadd.f32 %v806_v34, %v598_v36 }
 0x178   : > { %606 = vperm.xlu1 %799, %v603_v37  }
 0x1ea   : > { %v607_v38 = vpop.permute.xlu1 %606 }
 0x1eb   : > { %609 = vst [vmem:[%s339_s21] sm:$0xff] %v607_v38 }
 0x1ec   : > { %866 = shalt.err (!%p863_p7)
}
 0x1ed   : > { %751 = dma.vmem_to_hbm [thread:$0]  (%p1004_p11), %s624_s9, 128, %s626_s10, %s611_s17  }
 0x1ee PF: > { %s637_s23 = sand.u32 1, %s893_s26   ;;  %p1242_p5 = scmp.ge.s32.totalorder %s905_s29, 2 }
 0x1ef   : > { %s638_s12 = scalar_lea.sflag [#allocation5], %s637_s23 }
 0x1f0   : > { %p758_p8 = pnand %p1242_p5, %p1008_p12 }
 0x1f2   : > { %p759_p10 = pneg %p758_p8 }
 0x1f4   : > { %888 = dma.done.wait (%p759_p10), %s638_s12, 128  }
 0x1f5   : > { %890 = vsyncadd (%p759_p10), %s638_s12, 4294967168  ;;  %p22_p2 = scmp.ge.s32.totalorder %s979_s8, 4   ;;  %s1243_s26 = smov %s897_s27 }
 0x1f6   : > { %s1244_s27 = smov %s901_s28  ;;  %s1245_s28 = smov %s991_s11 }
 0x1f7   : > { %s1246_s29 = smov %s979_s8  ;;  %24 = sbr.rel (!%p22_p2) target bundleno = 8 (0x8), region = 102 }
 0x1fc   :  { %644 = vsyncpa [#allocation4], 1 }
 0x1fd   :  { %646 = vsyncpa [#allocation4 + $0x1], 1 }
 0x1fe   :  { %647 = vsyncpa [#allocation5], 1 }
 0x1ff   :  { %649 = vsyncpa [#allocation5 + $0x1], 1 }

</bundles_post_ra>
